<compile_context>
chip_gen: v5e
topology: v5e:2x2
jax: 0.10.0
libtpu: 0.0.40
codegen_flags: <defaults>
</compile_context>

<pallas_src>
import functools

import jax
import jax.numpy as jnp
from jax import lax
from jax.experimental import pallas as pl
from jax.experimental.pallas import tpu as pltpu


def _cwn_kernel(x_ref, gamma_ref, beta_ref, o_ref, *, eps: float, inv_n: float,
                F1: int, C: int):
    # x_ref block: (TB, F1*C, Tp) -- TB batches, flattened channels, padded T.
    x = x_ref[...].astype(jnp.float32)                     # (TB, FC, Tp)

    # Lane-axis (T) reduction first: the only full-size reductions.
    s_fc = jnp.sum(x, axis=2)                              # (TB, FC)
    s2_fc = jnp.sum(x * x, axis=2)                         # (TB, FC)

    # Per-group combine: flattened channel index is f1*C + c, group index is c.
    # Static unrolled loop over F1 on tiny post-reduction (TB, C) tensors.
    s = s_fc[:, 0:C]
    s2 = s2_fc[:, 0:C]
    for f1 in range(1, F1):
        s = s + s_fc[:, f1 * C:(f1 + 1) * C]
        s2 = s2 + s2_fc[:, f1 * C:(f1 + 1) * C]

    mean = s * inv_n                                       # (TB, C)
    # Clamp: single-pass variance can be slightly negative -> rsqrt NaN guard.
    var = jnp.maximum(s2 * inv_n - mean * mean, 0.0)
    inv_std = lax.rsqrt(var + eps)                         # (TB, C)

    # Broadcast per-group stats back to the flattened channel axis
    # (index f1*C + c maps to group c, so a lane-tile by F1 is exactly right).
    inv_std_fc = jnp.tile(inv_std, (1, F1))                # (TB, FC)
    mean_fc = jnp.tile(mean, (1, F1))                      # (TB, FC)

    gamma = gamma_ref[...].astype(jnp.float32)             # (1, FC)
    beta = beta_ref[...].astype(jnp.float32)               # (1, FC)

    # Fused normalize + affine: y = x*scale + shift (2 VPU ops per element).
    scale = gamma * inv_std_fc                             # (TB, FC)
    shift = beta - mean_fc * scale                         # (TB, FC)
    o_ref[...] = (x * scale[:, :, None] + shift[:, :, None]).astype(o_ref.dtype)


def _largest_divisor_leq(n: int, cap: int) -> int:
    cap = max(1, min(n, cap))
    for d in range(cap, 0, -1):
        if n % d == 0:
            return d
    return 1


def channel_wise_norm(x, gamma, beta, *, in_chans, F1, eps=1e-5):
    """x: (B, F1, in_chans, T); gamma/beta: (in_chans * F1,). Returns same shape as x."""
    B, F1_, C, T = x.shape
    assert F1_ == F1 and C == in_chans
    FC = F1 * C

    # Zero-pad T to a multiple of 128 for lane-dense loads/stores; stats remain
    # exact (zeros contribute nothing, inv_n uses the true F1*T).
    Tp = T if T % 128 == 0 else ((T + 127) // 128) * 128

    # Free contiguous reshape to (B, F1*C, T): full sublane occupancy when C < 8.
    x3 = x.reshape(B, FC, T)
    if Tp != T:
        x3 = jnp.pad(x3, ((0, 0), (0, 0), (0, Tp - T)))

    # PyTorch channel index is c*F1 + f1; our flattened index is f1*C + c.
    gamma_fc = jnp.transpose(gamma.reshape(C, F1)).reshape(1, FC)
    beta_fc = jnp.transpose(beta.reshape(C, F1)).reshape(1, FC)

    # Batch tiling: pick the largest divisor of B whose block is <= ~4 MiB, so the
    # double-buffered in+out blocks land in the recommended ~4-16 MiB range.
    itemsize = jnp.dtype(x.dtype).itemsize
    per_batch_bytes = FC * Tp * itemsize
    tb_cap = max(1, (4 * 1024 * 1024) // per_batch_bytes)
    TB = _largest_divisor_leq(B, tb_cap)

    block_bytes = TB * per_batch_bytes
    block_f32_bytes = TB * FC * Tp * 4
    # 2x double-buffered input + 2x output + ~3 f32-sized in-kernel temps + margin.
    vmem_limit = int(min(max(4 * block_bytes + 3 * block_f32_bytes + (2 << 20),
                             16 << 20),
                         64 << 20))

    kernel = functools.partial(
        _cwn_kernel, eps=float(eps), inv_n=1.0 / float(F1 * T), F1=F1, C=C)

    cost = pl.CostEstimate(
        flops=6 * B * FC * Tp,
        transcendentals=B * C,
        bytes_accessed=2 * B * FC * Tp * itemsize + 2 * FC * 4,
    )

    # NOTE: callers that can donate x may additionally pass
    # input_output_aliases={0: 0} to avoid a second HBM allocation.
    y3 = pl.pallas_call(
        kernel,
        out_shape=jax.ShapeDtypeStruct((B, FC, Tp), x.dtype),
        grid=(B // TB,),
        in_specs=[
            pl.BlockSpec((TB, FC, Tp), lambda b: (b, 0, 0)),
            pl.BlockSpec((1, FC), lambda b: (0, 0)),
            pl.BlockSpec((1, FC), lambda b: (0, 0)),
        ],
        out_specs=pl.BlockSpec((TB, FC, Tp), lambda b: (b, 0, 0)),
        compiler_params=pltpu.CompilerParams(
            dimension_semantics=("parallel",),
            vmem_limit_bytes=vmem_limit,
        ),
        cost_estimate=cost,
    )(x3, gamma_fc, beta_fc)

    if Tp != T:
        y3 = y3[:, :, :T]
    return y3.reshape(B, F1, C, T)


def _reference(x, gamma, beta, *, in_chans, F1, eps=1e-5):
    # Pure-JAX reference mirroring torch.nn.GroupNorm semantics of the module.
    B, F1_, C, T = x.shape
    xp = jnp.transpose(x, (0, 2, 1, 3)).reshape(B, in_chans, F1 * T)
    mean = jnp.mean(xp, axis=-1, keepdims=True)
    var = jnp.mean((xp - mean) ** 2, axis=-1, keepdims=True)
    xn = (xp - mean) / jnp.sqrt(var + eps)
    xn = xn.reshape(B, in_chans, F1, T)
    g = gamma.reshape(1, in_chans, F1, 1)
    b = beta.reshape(1, in_chans, F1, 1)
    y = xn * g + b
    return jnp.transpose(y, (0, 2, 1, 3))


if __name__ == "__main__":
    key = jax.random.PRNGKey(0)

    # Primary config (matches the module defaults at small demo shapes).
    in_chans, F1 = 4, 4
    B, T = 2, 16
    kx, kg, kb, k2 = jax.random.split(key, 4)
    x = jax.random.normal(kx, (B, F1, in_chans, T), dtype=jnp.float32)
    gamma = 1.0 + 0.1 * jax.random.normal(kg, (in_chans * F1,), dtype=jnp.float32)
    beta = 0.1 * jax.random.normal(kb, (in_chans * F1,), dtype=jnp.float32)

    y = channel_wise_norm(x, gamma, beta, in_chans=in_chans, F1=F1)
    y = jax.block_until_ready(y)
    y_ref = _reference(x, gamma, beta, in_chans=in_chans, F1=F1)
    assert y.shape == x.shape
    assert jnp.allclose(y, y_ref, atol=1e-4, rtol=1e-4), "mismatch vs reference (cfg A)"

    # Secondary check: lane-aligned T (no pad path), different F1, nonzero mean.
    in_chans2, F12, B2, T2 = 4, 8, 3, 256
    x2 = 3.0 + jax.random.normal(k2, (B2, F12, in_chans2, T2), dtype=jnp.float32)
    gamma2 = jnp.linspace(0.5, 1.5, in_chans2 * F12, dtype=jnp.float32)
    beta2 = jnp.linspace(-0.2, 0.2, in_chans2 * F12, dtype=jnp.float32)
    y2 = jax.block_until_ready(
        channel_wise_norm(x2, gamma2, beta2, in_chans=in_chans2, F1=F12))
    y2_ref = _reference(x2, gamma2, beta2, in_chans=in_chans2, F1=F12)
    assert jnp.allclose(y2, y2_ref, atol=1e-4, rtol=1e-4), "mismatch vs reference (cfg B)"

    print("KERNEL_OK")
</pallas_src>

<mosaic_0001>
module attributes {stable_mosaic.version = 11 : i64} {
  func.func @_cwn_kernel(%arg0: i32, %arg1: memref<2x16x128xf32, #tpu.memory_space<vmem>>, %arg2: memref<1x16xf32, #tpu.memory_space<vmem>>, %arg3: memref<1x16xf32, #tpu.memory_space<vmem>>, %arg4: memref<2x16x128xf32, #tpu.memory_space<vmem>>) attributes {dimension_semantics = [#tpu.dimension_semantics<parallel>], iteration_bounds = array<i64: 1>, scalar_prefetch = 0 : i64, scratch_operands = 0 : i64, tpu.core_type = #tpu.core_type<tc>, window_params = [{transform_indices = @transform_0, window_bounds = array<i64: 2, 16, 128>}, {pipeline_mode = #tpu.pipeline_mode<synchronous>, transform_indices = @transform_1, window_bounds = array<i64: 1, 16>}, {pipeline_mode = #tpu.pipeline_mode<synchronous>, transform_indices = @transform_2, window_bounds = array<i64: 1, 16>}, {transform_indices = @transform_3, window_bounds = array<i64: 2, 16, 128>}]} {
    %c0 = arith.constant 0 : index
    %c0_0 = arith.constant 0 : index
    %c0_1 = arith.constant 0 : index
    %0 = vector.load %arg1[%c0, %c0_0, %c0_1] : memref<2x16x128xf32, #tpu.memory_space<vmem>>, vector<2x16x128xf32>
    %cst = arith.constant dense<0.000000e+00> : vector<2x16xf32>
    %1 = vector.multi_reduction <add>, %0, %cst [2] : vector<2x16x128xf32> to vector<2x16xf32>
    %2 = arith.mulf %0, %0 : vector<2x16x128xf32>
    %cst_2 = arith.constant dense<0.000000e+00> : vector<2x16xf32>
    %3 = vector.multi_reduction <add>, %2, %cst_2 [2] : vector<2x16x128xf32> to vector<2x16xf32>
    %4 = vector.extract_strided_slice %1 {offsets = [0, 0], sizes = [2, 4], strides = [1, 1]} : vector<2x16xf32> to vector<2x4xf32>
    %5 = vector.extract_strided_slice %3 {offsets = [0, 0], sizes = [2, 4], strides = [1, 1]} : vector<2x16xf32> to vector<2x4xf32>
    %6 = vector.extract_strided_slice %1 {offsets = [0, 4], sizes = [2, 4], strides = [1, 1]} : vector<2x16xf32> to vector<2x4xf32>
    %7 = arith.addf %4, %6 : vector<2x4xf32>
    %8 = vector.extract_strided_slice %3 {offsets = [0, 4], sizes = [2, 4], strides = [1, 1]} : vector<2x16xf32> to vector<2x4xf32>
    %9 = arith.addf %5, %8 : vector<2x4xf32>
    %10 = vector.extract_strided_slice %1 {offsets = [0, 8], sizes = [2, 4], strides = [1, 1]} : vector<2x16xf32> to vector<2x4xf32>
    %11 = arith.addf %7, %10 : vector<2x4xf32>
    %12 = vector.extract_strided_slice %3 {offsets = [0, 8], sizes = [2, 4], strides = [1, 1]} : vector<2x16xf32> to vector<2x4xf32>
    %13 = arith.addf %9, %12 : vector<2x4xf32>
    %14 = vector.extract_strided_slice %1 {offsets = [0, 12], sizes = [2, 4], strides = [1, 1]} : vector<2x16xf32> to vector<2x4xf32>
    %15 = arith.addf %11, %14 : vector<2x4xf32>
    %16 = vector.extract_strided_slice %3 {offsets = [0, 12], sizes = [2, 4], strides = [1, 1]} : vector<2x16xf32> to vector<2x4xf32>
    %17 = arith.addf %13, %16 : vector<2x4xf32>
    %cst_3 = arith.constant 1.562500e-02 : f32
    %18 = vector.broadcast %cst_3 : f32 to vector<2x4xf32>
    %19 = arith.mulf %15, %18 : vector<2x4xf32>
    %cst_4 = arith.constant 1.562500e-02 : f32
    %20 = vector.broadcast %cst_4 : f32 to vector<2x4xf32>
    %21 = arith.mulf %17, %20 : vector<2x4xf32>
    %22 = arith.mulf %19, %19 : vector<2x4xf32>
    %23 = arith.subf %21, %22 : vector<2x4xf32>
    %cst_5 = arith.constant 0.000000e+00 : f32
    %24 = vector.broadcast %cst_5 : f32 to vector<2x4xf32>
    %25 = arith.maximumf %23, %24 : vector<2x4xf32>
    %cst_6 = arith.constant 9.99999974E-6 : f32
    %26 = vector.broadcast %cst_6 : f32 to vector<2x4xf32>
    %27 = arith.addf %25, %26 : vector<2x4xf32>
    %28 = math.rsqrt %27 : vector<2x4xf32>
    %29 = tpu.concatenate %28, %28, %28, %28 in 1 : vector<2x4xf32>, vector<2x4xf32>, vector<2x4xf32>, vector<2x4xf32> -> vector<2x16xf32>
    %30 = tpu.concatenate %19, %19, %19, %19 in 1 : vector<2x4xf32>, vector<2x4xf32>, vector<2x4xf32>, vector<2x4xf32> -> vector<2x16xf32>
    %c0_7 = arith.constant 0 : index
    %c0_8 = arith.constant 0 : index
    %31 = vector.load %arg2[%c0_7, %c0_8] : memref<1x16xf32, #tpu.memory_space<vmem>>, vector<1x16xf32>
    %c0_9 = arith.constant 0 : index
    %c0_10 = arith.constant 0 : index
    %32 = vector.load %arg3[%c0_9, %c0_10] : memref<1x16xf32, #tpu.memory_space<vmem>>, vector<1x16xf32>
    %33 = vector.broadcast %31 : vector<1x16xf32> to vector<2x16xf32>
    %34 = arith.mulf %33, %29 : vector<2x16xf32>
    %35 = arith.mulf %30, %34 : vector<2x16xf32>
    %36 = vector.broadcast %32 : vector<1x16xf32> to vector<2x16xf32>
    %37 = arith.subf %36, %35 : vector<2x16xf32>
    %38 = vector.shape_cast %34 : vector<2x16xf32> to vector<2x16x1xf32>
    %39 = vector.broadcast %38 : vector<2x16x1xf32> to vector<2x16x128xf32>
    %40 = arith.mulf %0, %39 : vector<2x16x128xf32>
    %41 = vector.shape_cast %37 : vector<2x16xf32> to vector<2x16x1xf32>
    %42 = vector.broadcast %41 : vector<2x16x1xf32> to vector<2x16x128xf32>
    %43 = arith.addf %40, %42 : vector<2x16x128xf32>
    %c0_11 = arith.constant 0 : index
    %c0_12 = arith.constant 0 : index
    %c0_13 = arith.constant 0 : index
    %44 = vector.load %arg4[%c0_11, %c0_12, %c0_13] : memref<2x16x128xf32, #tpu.memory_space<vmem>>, vector<2x16x128xf32>
    tpu.vector_store %arg4[%c0_11, %c0_12, %c0_13], %43 {strides = array<i32>} : memref<2x16x128xf32, #tpu.memory_space<vmem>>, vector<2x16x128xf32>,
    return
  }
  func.func @transform_0(%arg0: i32) -> (i32, i32, i32) {
    %c0_i32 = arith.constant 0 : i32
    %c0_i32_0 = arith.constant 0 : i32
    %c0_i32_1 = arith.constant 0 : i32
    return %arg0, %c0_i32, %c0_i32_0 : i32, i32, i32
  }
  func.func @transform_1(%arg0: i32) -> (i32, i32) {
    %c0_i32 = arith.constant 0 : i32
    %c0_i32_0 = arith.constant 0 : i32
    %c0_i32_1 = arith.constant 0 : i32
    return %c0_i32, %c0_i32_0 : i32, i32
  }
  func.func @transform_2(%arg0: i32) -> (i32, i32) {
    %c0_i32 = arith.constant 0 : i32
    %c0_i32_0 = arith.constant 0 : i32
    %c0_i32_1 = arith.constant 0 : i32
    return %c0_i32, %c0_i32_0 : i32, i32
  }
  func.func @transform_3(%arg0: i32) -> (i32, i32, i32) {
    %c0_i32 = arith.constant 0 : i32
    %c0_i32_0 = arith.constant 0 : i32
    %c0_i32_1 = arith.constant 0 : i32
    return %arg0, %c0_i32, %c0_i32_0 : i32, i32, i32
  }
}

</mosaic_0001>

<bundles_post_ra>
// kernel: tpu_custom_call.1
= control target key start
LH: loop header
LB: loop body
LE: loop exit
PB: predicated region body
PF: predicated region fallthrough
CT: control target
= control target key end

     0   :  { %8 = vsyncpa [#allocation3], 0  ;;  %s472_s0 = inlined_call_operand.hbm [shape: f32[2,16,128], index: 0, kind: input, shape index: {}]   ;;  %s473_s1 = inlined_call_operand.hbm [shape: f32[1,16], index: 1, kind: input, shape index: {}]   ;;  %s474_s2 = inlined_call_operand.vmem [shape: f32[1,16], index: 2, kind: input, shape index: {}]   ;;  %s475_s3 = inlined_call_operand.hbm [shape: f32[2,16,128], index: 3, kind: output, shape index: {}]  }
   0x1   :  { %9 = vsyncpa [#allocation6], 0 }
   0x2   :  { %10 = vsyncpa [#allocation4], 0  ;;  %s15_s14 = sshll.u32 %s472_s0, 4  ;;  %s394_s15 = smov [#allocation2]   ;;  %s16_s14 = int_to_ptr.hbm [resolvable:$true] %s15_s14 }
   0x3   :  { %s17_s16 = sshll.u32 %s394_s15, 4  ;;  %s29_s19 = sshll.u32 %s473_s1, 4  ;;  %s18_s16 = int_to_ptr.vmem [resolvable:$true] %s17_s16  ;;  %s30_s19 = int_to_ptr.hbm [resolvable:$true] %s29_s19 }
   0x4   :  { %s395_s20 = smov 128   ;;  %s396_s21 = smov 8  }
   0x5   :  { %23 = dma.hbm_to_vmem [thread:$0]  %s16_s14, 512, %s18_s16, [#allocation3], %s395_s20, %s395_s20, %s396_s21  }
   0x6   :  { %s397_s22 = smov [#allocation5]  }
   0x7   :  { %s31_s23 = sshll.u32 %s397_s22, 4  ;;  %s32_s23 = int_to_ptr.vmem [resolvable:$true] %s31_s23 }
   0x8   :  { %34 = dma.hbm_to_vmem [thread:$0]  %s30_s19, 16, %s32_s23, [#allocation6]  }
   0x9   :  { %388 = dma.done.wait [#allocation3], 512  }
   0xa   :  { %389 = vsyncadd [#allocation3], 4294966784 }
   0xb   :  { %390 = dma.done.wait [#allocation6], 16  }
   0xc   :  { %391 = vsyncadd [#allocation6], 4294967280  ;;  %v429_v0 = vld [vmem:[#allocation2] sm:$0xff]  ;;  %v431_v1 = vld [vmem:[#allocation2 + $0x8] sm:$0xff]  ;;  %v398_v8 = vmov 0   ;;  %v145_v63 = vlaneseq  ;;  %vm149_vm6 = vcmask 1041409  }
   0xd   :  { %49 = vadd.xlane.f32.xlu0 %v429_v0  ;;  %v57_v2 = vmul.f32 %v429_v0, %v429_v0  ;;  %51 = vadd.xlane.f32.xlu2 %v431_v1  ;;  %v437_v3 = vld [vmem:[#allocation2 + $0x10] sm:$0xff]  ;;  %v439_v4 = vld [vmem:[#allocation2 + $0x18] sm:$0xff]  ;;  %v58_v6 = vmul.f32 %v431_v1, %v431_v1  ;;  %vm167_vm7 = vcmask 31744   ;;  %vm169_vm8 = vcmask 64512   ;;  %s281_s27 = sshll.u32 %s475_s3, 4  ;;  %s282_s27 = int_to_ptr.hbm [resolvable:$true] %s281_s27 }
   0xe   :  { %v59_v5 = vmul.f32 %v437_v3, %v437_v3  ;;  %v60_v7 = vmul.f32 %v439_v4, %v439_v4  ;;  %303 = vset.pattern.permute.xlu1 %v398_v8  ;;  %301 = vset.pattern.permute.xlu2 %v398_v8  ;;  %vm171_vm9 = vcmask 97280  }
   0xf   :  { %61 = vadd.xlane.f32.xlu1 %v57_v2  ;;  %302 = vset.pattern.permute.xlu0 %v398_v8  ;;  %v213_v2 = vshrl.u32 %v145_v63, 7 }
  0x15   :  { %53 = vadd.xlane.f32.xlu0 %v437_v3  ;;  %55 = vadd.xlane.f32.xlu2 %v439_v4 }
  0x17   :  { %65 = vadd.xlane.f32.xlu1 %v59_v5  ;;  %v220_v5 = vadd.s32 8, %v213_v2 }
  0x1d   :  { %63 = vadd.xlane.f32.xlu0 %v58_v6 }
  0x1f   :  { %67 = vadd.xlane.f32.xlu1 %v60_v7  ;;  %v146_v7 = vand.u32 127, %v145_v63 }
  0x80   :  { %v50_v9 = vpop.xlane.xlu0 %49  ;;  %v52_v10 = vpop.xlane.xlu2 %51 }
  0x81   :  { %v71_v11 = vrot.slane %v50_v9, 4  ;;  %v91_v14 = vrot.slane %v52_v10, 4 }
  0x82   :  { %v62_v12 = vpop.xlane.xlu1 %61 }
  0x83   :  { %v75_v13 = vadd.f32 %v71_v11, %v50_v9  ;;  %v79_v22 = vrot.slane %v62_v12, 4  ;;  %v152_v9 = vadd.s32 4294967292, %v146_v7 }
  0x85   :  { %v85_v15 = vadd.f32 %v75_v13, %v52_v10  ;;  %v83_v27 = vadd.f32 %v79_v22, %v62_v12  ;;  %v157_v13 = vadd.s32 4294967288, %v146_v7 }
  0x87   :  { %v95_v16 = vadd.f32 %v91_v14, %v85_v15 }
  0x88   :  { %v54_v17 = vpop.xlane.xlu0 %53  ;;  %v56_v18 = vpop.xlane.xlu2 %55 }
  0x89   :  { %v72_v19 = vrot.slane %v54_v17, 4  ;;  %v105_v20 = vmul.f32 0.015625, %v95_v16  ;;  %v92_v24 = vrot.slane %v56_v18, 4 }
  0x8a   :  { %v66_v21 = vpop.xlane.xlu1 %65 }
  0x8b   :  { %v76_v23 = vadd.f32 %v72_v19, %v54_v17  ;;  %176 = vperm.xlu1 %303, %v105_v20   ;;  %v80_v25 = vrot.slane %v66_v21, 4  ;;  %v109_v38 = vmul.f32 %v105_v20, %v105_v20  ;;  %v162_v17 = vadd.s32 4294967284, %v146_v7 }
  0x8d   :  { %v86_v26 = vadd.f32 %v76_v23, %v56_v18  ;;  %v84_v30 = vadd.f32 %v80_v25, %v66_v21 }
  0x8f   :  { %v96_v28 = vadd.f32 %v92_v24, %v86_v26 }
  0x90   :  { %v64_v29 = vpop.xlane.xlu0 %63 }
  0x91   :  { %v87_v31 = vadd.f32 %v83_v27, %v64_v29  ;;  %v99_v32 = vrot.slane %v64_v29, 4  ;;  %v106_v34 = vmul.f32 0.015625, %v96_v28 }
  0x92   :  { %v68_v33 = vpop.xlane.xlu1 %67 }
  0x93   :  { %v103_v35 = vadd.f32 %v99_v32, %v87_v31  ;;  %v88_v36 = vadd.f32 %v84_v30, %v68_v33  ;;  %v100_v37 = vrot.slane %v68_v33, 4  ;;  %v110_v41 = vmul.f32 %v106_v34, %v106_v34  ;;  %305 = vset.pattern.permute.xlu1 %v220_v5 }
  0x95   :  { %v107_v39 = vmul.f32 0.015625, %v103_v35  ;;  %v104_v40 = vadd.f32 %v100_v37, %v88_v36  ;;  %v310_v36 = vld [vmem:[#allocation5] ss:$0 sm:$0xff] }
  0x97   :  { %v111_v42 = vsub.f32 %v107_v39, %v109_v38  ;;  %v108_v43 = vmul.f32 0.015625, %v104_v40 }
  0x99   :  { %v113_v44 = vmax.f32 %v111_v42, 0.0  ;;  %v112_v45 = vsub.f32 %v108_v43, %v110_v41 }
  0x9b   :  { %v115_v46 = vadd.f32 1e-05, %v113_v44  ;;  %v114_v47 = vmax.f32 %v112_v45, 0.0  ;;  %v311_v45 = vld [vmem:[%s474_s2] ss:$0 sm:$0xff]  ;;  %s399_s2 = smov [#allocation7]  }
  0x9c   :  { %s279_s24 = sshll.u32 %s399_s2, 4  ;;  %s280_s24 = int_to_ptr.vmem [resolvable:$true] %s279_s24 }
  0x9d   :  { %312 = vrsqrt.f32 %v115_v46  ;;  %v116_v48 = vadd.f32 1e-05, %v114_v47  ;;  %vm123_vm1 = vweird.f32 %v115_v46 }
  0x9f   :  { %314 = vrsqrt.f32 %v116_v48  ;;  %vm133_vm4 = vweird.f32 %v116_v48 }
  0xa3   :  { %v313_v49 = vpop.eup %312 }
  0xa4   :  { %v118_v50 = vmul.f32 %v313_v49, %v115_v46  ;;  %vm124_vm0 = vweird.f32 %v313_v49 }
  0xa5   :  { %v315_v51 = vpop.eup %314  ;;  %vm125_vm3 = vmor %vm123_vm1, %vm124_vm0 }
  0xa6   :  { %v119_v52 = vmul.f32 %v313_v49, %v118_v50  ;;  %v128_v53 = vmul.f32 %v315_v51, %v116_v48  ;;  %vm134_vm2 = vweird.f32 %v315_v51 }
  0xa7   :  { %vm135_vm5 = vmor %vm133_vm4, %vm134_vm2 }
  0xa8   :  { %v120_v54 = vmul.f32 0.5, %v119_v52  ;;  %v129_v55 = vmul.f32 %v315_v51, %v128_v53 }
  0xaa   :  { %v121_v56 = vsub.f32 1.5, %v120_v54  ;;  %v130_v57 = vmul.f32 0.5, %v129_v55 }
  0xac   :  { %v122_v58 = vmul.f32 %v313_v49, %v121_v56  ;;  %v131_v59 = vsub.f32 1.5, %v130_v57 }
  0xae   :  { %v126_v60 = vsel %vm125_vm3, %v313_v49, %v122_v58  ;;  %v132_v61 = vmul.f32 %v315_v51, %v131_v59 }
  0xaf   :  { %140 = vperm.xlu2 %301, %v126_v60  }
  0xb0   :  { %v136_v62 = vsel %vm135_vm5, %v315_v51, %v132_v61 }
  0xb1   :  { %143 = vperm.xlu0 %302, %v136_v62  }
  0xb7   :  { %179 = vperm.xlu2 %301, %v106_v34  }
  0xb9   :  { %306 = vset.pattern.permute.xlu0 %v213_v2 }
  0xbf   :  { %304 = vset.pattern.permute.xlu2 %v213_v2 }
  0xfd   :  { %v177_v10 = vpop.permute.xlu1 %176 }
  0xfe   :  { %v181_v14 = vperm.slane %v177_v10, %v146_v7  ;;  %v185_v15 = vperm.slane %v177_v10, %v152_v9  ;;  %v189_v20 = vperm.slane %v177_v10, %v157_v13  ;;  %v193_v38 = vperm.slane %v177_v10, %v162_v17 }
 0x109   :  { %v141_v6 = vpop.permute.xlu2 %140 }
 0x10a   :  { %v147_v21 = vperm.slane %v141_v6, %v146_v7  ;;  %v153_v22 = vperm.slane %v141_v6, %v152_v9  ;;  %v158_v23 = vperm.slane %v141_v6, %v157_v13  ;;  %v163_v29 = vperm.slane %v141_v6, %v162_v17 }
 0x111   :  { %v180_v8 = vpop.permute.xlu2 %179 }
 0x112   :  { %v182_v11 = vperm.slane %v180_v8, %v146_v7  ;;  %v186_v12 = vperm.slane %v180_v8, %v152_v9  ;;  %v190_v16 = vperm.slane %v180_v8, %v157_v13  ;;  %v194_v32 = vperm.slane %v180_v8, %v162_v17 }
 0x114   :  { %v183_v18 = vsel %vm149_vm6, %v182_v11, %v181_v14  ;;  %v187_v19 = vsel %vm149_vm6, %v186_v12, %v185_v15  ;;  %v191_v30 = vsel %vm149_vm6, %v190_v16, %v189_v20  ;;  %v195_v43 = vsel %vm149_vm6, %v194_v32, %v193_v38 }
 0x115   :  { %v197_v31 = vsel %vm167_vm7, %v183_v18, %v187_v19 }
 0x116   :  { %v198_v41 = vsel %vm169_vm8, %v197_v31, %v191_v30 }
 0x117   :  { %v199_v46 = vsel %vm171_vm9, %v198_v41, %v195_v43 }
 0x123   :  { %v144_v24 = vpop.permute.xlu0 %143 }
 0x124   :  { %v148_v25 = vperm.slane %v144_v24, %v146_v7  ;;  %v154_v26 = vperm.slane %v144_v24, %v152_v9  ;;  %v159_v27 = vperm.slane %v144_v24, %v157_v13  ;;  %v164_v28 = vperm.slane %v144_v24, %v162_v17 }
 0x126   :  { %v150_v33 = vsel %vm149_vm6, %v148_v25, %v147_v21  ;;  %v155_v34 = vsel %vm149_vm6, %v154_v26, %v153_v22  ;;  %v160_v35 = vsel %vm149_vm6, %v159_v27, %v158_v23  ;;  %v165_v39 = vsel %vm149_vm6, %v164_v28, %v163_v29 }
 0x127   :  { %v168_v37 = vsel %vm167_vm7, %v150_v33, %v155_v34 }
 0x128   :  { %v170_v40 = vsel %vm169_vm8, %v168_v37, %v160_v35 }
 0x129   :  { %v172_v42 = vsel %vm171_vm9, %v170_v40, %v165_v39 }
 0x12a   :  { %v205_v44 = vmul.f32 %v310_v36, %v172_v42 }
 0x12c   :  { %v211_v47 = vperm.slane %v205_v44, 0  ;;  %v206_v48 = vmul.f32 %v205_v44, %v199_v46  ;;  %v224_v51 = vperm.slane %v205_v44, 1 }
 0x12e   :  { %222 = vperm.xlu1 %305, %v211_v47   ;;  %216 = vperm.xlu2 %304, %v211_v47   ;;  %v210_v49 = vsub.f32 %v311_v45, %v206_v48 }
 0x130   :  { %v241_v50 = vperm.slane %v210_v49, 0  ;;  %v254_v52 = vperm.slane %v210_v49, 1 }
 0x132   :  { %246 = vperm.xlu0 %306, %v241_v50  }
 0x136   :  { %235 = vperm.xlu1 %305, %v224_v51   ;;  %229 = vperm.xlu2 %304, %v224_v51  }
 0x13a   :  { %309 = vset.pattern.permute.xlu0 %v220_v5 }
 0x13e   :  { %308 = vset.pattern.permute.xlu1 %v213_v2  ;;  %307 = vset.pattern.permute.xlu2 %v220_v5 }
 0x146   :  { %259 = vperm.xlu1 %308, %v254_v52   ;;  %252 = vperm.xlu2 %307, %v241_v50  }
 0x14e   :  { %265 = vperm.xlu2 %307, %v254_v52  }
 0x188   :  { %v217_v53 = vpop.permute.xlu2 %216 }
 0x189   :  { %v237_v58 = vmul.f32 %v217_v53, %v429_v0 }
 0x190   :  { %v230_v54 = vpop.permute.xlu2 %229 }
 0x1a0   :  { %v253_v55 = vpop.permute.xlu2 %252  ;;  %v223_v56 = vpop.permute.xlu1 %222 }
 0x1a1   :  { %v238_v57 = vmul.f32 %v223_v56, %v431_v1  ;;  %v239_v1 = vmul.f32 %v230_v54, %v437_v3 }
 0x1a3   :  { %v268_v59 = vadd.f32 %v253_v55, %v238_v57 }
 0x1a4   :  { %v247_v60 = vpop.permute.xlu0 %246 }
 0x1a5   :  { %272 = vst [vmem:[#allocation7 + $0x8] sm:$0xff] %v268_v59  ;;  %v267_v61 = vadd.f32 %v247_v60, %v237_v58 }
 0x1a7   :  { %271 = vst [vmem:[#allocation7] sm:$0xff] %v267_v61 }
 0x1a8   :  { %v236_v62 = vpop.permute.xlu1 %235  ;;  %v266_v2 = vpop.permute.xlu2 %265 }
 0x1a9   :  { %v240_v63 = vmul.f32 %v236_v62, %v439_v4 }
 0x1ab   :  { %v270_v5 = vadd.f32 %v266_v2, %v240_v63 }
 0x1ad   :  { %274 = vst [vmem:[#allocation7 + $0x18] sm:$0xff] %v270_v5 }
 0x1b8   :  { %v260_v0 = vpop.permute.xlu1 %259 }
 0x1b9   :  { %v269_v6 = vadd.f32 %v260_v0, %v239_v1 }
 0x1bb   :  { %273 = vst [vmem:[#allocation7 + $0x10] sm:$0xff] %v269_v6 }
 0x1bc   :  { %287 = dma.vmem_to_hbm [thread:$0]  %s280_s24, 512, %s282_s27, [#allocation4], %s395_s20, %s395_s20, %s396_s21  }
 0x1bd   :  { %392 = dma.done.wait [#allocation4], 512  }
 0x1be   :  { %393 = vsyncadd [#allocation4], 4294966784 }
 0x1bf   :  { %292 = vsyncpa [#allocation3], 1 }
 0x1c0   :  { %293 = vsyncpa [#allocation6], 1 }
 0x1c1   :  { %294 = vsyncpa [#allocation4], 1 }

</bundles_post_ra>
